<compile_context>
chip_gen: v7x
topology: tpu7x:2x2x1
jax: 0.10.0
libtpu: 0.0.40
codegen_flags: <defaults>
</compile_context>

<pallas_src>
import jax
import jax.numpy as jnp
from jax.experimental import pallas as pl
from jax.experimental.pallas import tpu as pltpu


def _logreg_kernel(x_ref, w_ref, b_ref, o_ref):
    # x_ref: (N, D) VMEM, w_ref: (1, D) VMEM (lane-dense), b_ref: (1,) SMEM.
    x = x_ref[...]                       # (N, D)
    w = w_ref[...]                       # (1, D), broadcasts over rows
    b = b_ref[0]                         # scalar bias from SMEM
    # VPU multiply + small lane-axis reduction; no MXU involvement.
    logits = jnp.sum(x * w, axis=-1, keepdims=True) + b   # (N, 1)
    o_ref[...] = jax.nn.sigmoid(logits).astype(o_ref.dtype)


def logistic_regression_forward(x, weight, bias):
    """Forward pass of sigmoid(nn.Linear(D, 1)(x)).

    Args:
      x:      (N, D) float32 — batch of samples, features on the lane axis.
      weight: (1, D) float32 — PyTorch nn.Linear weight layout, kept lane-dense.
      bias:   (1,)   float32 — scalar bias, routed to SMEM.
    Returns:
      (N, 1) float32 probabilities.
    """
    n, _ = x.shape
    return pl.pallas_call(
        _logreg_kernel,
        out_shape=jax.ShapeDtypeStruct((n, 1), jnp.float32),
        in_specs=[
            pl.BlockSpec(memory_space=pltpu.MemorySpace.VMEM),   # x, full array
            pl.BlockSpec(memory_space=pltpu.MemorySpace.VMEM),   # weight (1, D)
            pl.BlockSpec(memory_space=pltpu.MemorySpace.SMEM),   # bias scalar
        ],
        out_specs=pl.BlockSpec(memory_space=pltpu.MemorySpace.VMEM),
    )(x, weight, bias)


if __name__ == "__main__":
    key = jax.random.PRNGKey(0)
    kx1, kx2, kw, kb = jax.random.split(key, 4)

    # Mirror the script's synthetic data: two Gaussian blobs, 50 samples each.
    input_dim = 2
    X = jnp.concatenate(
        (
            jax.random.normal(kx1, (50, input_dim), dtype=jnp.float32) - 2.0,
            jax.random.normal(kx2, (50, input_dim), dtype=jnp.float32) + 2.0,
        ),
        axis=0,
    )  # (100, 2)

    # Deterministic nn.Linear(input_dim, 1) init: U(-1/sqrt(in), 1/sqrt(in)).
    # Parameters are prepared ONCE here in their kernel-friendly layout/dtype
    # (lane-dense (1, D) f32 weight, (1,) f32 bias) so the per-call wrapper
    # emits no transpose/convert HLO.
    bound = 1.0 / jnp.sqrt(jnp.float32(input_dim))
    weight = jax.random.uniform(
        kw, (1, input_dim), minval=-bound, maxval=bound, dtype=jnp.float32
    )
    bias = jax.random.uniform(
        kb, (1,), minval=-bound, maxval=bound, dtype=jnp.float32
    )

    y_pred = logistic_regression_forward(X, weight, bias)
    y_pred = jax.block_until_ready(y_pred)

    # Reference check in plain JAX.
    y_ref = jax.nn.sigmoid(X @ weight.T + bias)
    assert y_pred.shape == (100, 1)
    assert jnp.allclose(y_pred, y_ref, atol=1e-5), "mismatch vs reference"

    print("KERNEL_OK")
</pallas_src>

<mosaic_0001>
module attributes {stable_mosaic.version = 11 : i64} {
  func.func @_logreg_kernel(%arg0: memref<100x2xf32, #tpu.memory_space<vmem>>, %arg1: memref<1x2xf32, #tpu.memory_space<vmem>>, %arg2: memref<1xf32, #tpu.memory_space<smem>>, %arg3: memref<100x1xf32, #tpu.memory_space<vmem>>) attributes {dimension_semantics = [], scalar_prefetch = 0 : i64, scratch_operands = 0 : i64, tpu.core_type = #tpu.core_type<tc>} {
    %c0 = arith.constant 0 : index
    %c0_0 = arith.constant 0 : index
    %0 = vector.load %arg0[%c0, %c0_0] : memref<100x2xf32, #tpu.memory_space<vmem>>, vector<100x2xf32>
    %c0_1 = arith.constant 0 : index
    %c0_2 = arith.constant 0 : index
    %1 = vector.load %arg1[%c0_1, %c0_2] : memref<1x2xf32, #tpu.memory_space<vmem>>, vector<1x2xf32>
    %c0_3 = arith.constant 0 : index
    %2 = memref.load %arg2[%c0_3] : memref<1xf32, #tpu.memory_space<smem>>
    %3 = vector.broadcast %1 : vector<1x2xf32> to vector<100x2xf32>
    %4 = arith.mulf %0, %3 : vector<100x2xf32>
    %cst = arith.constant dense<0.000000e+00> : vector<100xf32>
    %5 = vector.multi_reduction <add>, %4, %cst [1] : vector<100x2xf32> to vector<100xf32>
    %6 = vector.shape_cast %5 : vector<100xf32> to vector<100x1xf32>
    %7 = vector.broadcast %2 : f32 to vector<100x1xf32>
    %8 = arith.addf %6, %7 : vector<100x1xf32>
    %9 = arith.negf %8 : vector<100x1xf32>
    %10 = math.exp %9 : vector<100x1xf32>
    %cst_4 = arith.constant 1.000000e+00 : f32
    %11 = vector.broadcast %cst_4 : f32 to vector<100x1xf32>
    %12 = arith.addf %11, %10 : vector<100x1xf32>
    %13 = arith.divf %11, %12 : vector<100x1xf32>
    %c0_5 = arith.constant 0 : index
    %c0_6 = arith.constant 0 : index
    %14 = vector.load %arg3[%c0_5, %c0_6] : memref<100x1xf32, #tpu.memory_space<vmem>>, vector<100x1xf32>
    tpu.vector_store %arg3[%c0_5, %c0_6], %13 {strides = array<i32>} : memref<100x1xf32, #tpu.memory_space<vmem>>, vector<100x1xf32>,
    return
  }
}

</mosaic_0001>

<bundles_post_ra>
// kernel: tpu_custom_call.1
= control target key start
LH: loop header
LB: loop body
LE: loop exit
PB: predicated region body
PF: predicated region fallthrough
CT: control target
= control target key end

     0   :  { %vm49_vm0 = vcmask 15360   ;;  %vm86_vm1 = vcmask 11264   ;;  %vm182_vm2 = vcmask 7168   ;;  %vm195_vm3 = vcmask 3072   ;;  %s410_s0 = inlined_call_operand.vmem [shape: f32[100,2], index: 0, kind: input, shape index: {}]   ;;  %s411_s1 = inlined_call_operand.vmem [shape: f32[1,2], index: 1, kind: input, shape index: {}]   ;;  %s412_s2 = inlined_call_operand.<no memory space> [shape: f32[1], index: 2, kind: input, shape index: {}]   ;;  %s413_s3 = inlined_call_operand.vmem [shape: f32[100,1], index: 3, kind: output, shape index: {}]  }
   0x1   :  { %v15_v0 = vld [vmem:[%s410_s0] sm:$0xff]  ;;  %v17_v2 = vld [vmem:[%s410_s0 + $0x10] sm:$0xff]  ;;  %v16_v5 = vld [vmem:[%s410_s0 + $0x8] sm:$0xff]  ;;  %v344_v40 = vstv %s412_s2 }
   0x2   :  { %v201_v1 = vld [vmem:[%s411_s1] ss:$0 sm:$0xff]  ;;  %v18_v6 = vld [vmem:[%s410_s0 + $0x18] sm:$0xff]  ;;  %v20_v10 = vld [vmem:[%s410_s0 + $0x28] sm:$0xff] }
   0x3   :  { %v36_v3 = vmul.f32 %v201_v1, %v15_v0  ;;  %v38_v4 = vmul.f32 %v201_v1, %v17_v2  ;;  %v37_v7 = vmul.f32 %v201_v1, %v16_v5  ;;  %v39_v8 = vmul.f32 %v201_v1, %v18_v6  ;;  %v19_v9 = vld [vmem:[%s410_s0 + $0x20] sm:$0xff]  ;;  %v21_v17 = vld [vmem:[%s410_s0 + $0x30] sm:$0xff]  ;;  %v22_v18 = vld [vmem:[%s410_s0 + $0x38] sm:$0xff] }
   0x4   :  { %v40_v15 = vmul.f32 %v201_v1, %v19_v9  ;;  %v41_v16 = vmul.f32 %v201_v1, %v20_v10  ;;  %v42_v21 = vmul.f32 %v201_v1, %v21_v17  ;;  %v43_v22 = vmul.f32 %v201_v1, %v22_v18  ;;  %v23_v23 = vld [vmem:[%s410_s0 + $0x40] sm:$0xff]  ;;  %v24_v24 = vld [vmem:[%s410_s0 + $0x48] sm:$0xff]  ;;  %v25_v29 = vld [vmem:[%s410_s0 + $0x50] sm:$0xff] }
   0x5   :  { %v50_v11 = vsel %vm49_vm0, %v36_v3, 0.0  ;;  %v56_v12 = vsel %vm49_vm0, %v38_v4, 0.0  ;;  %v53_v13 = vsel %vm49_vm0, %v37_v7, 0.0  ;;  %v59_v14 = vsel %vm49_vm0, %v39_v8, 0.0  ;;  %v26_v30 = vld [vmem:[%s410_s0 + $0x58] sm:$0xff] }
   0x6   :  { %51 = vadd.xlane.f32.xlu0 %v50_v11  ;;  %57 = vadd.xlane.f32.xlu1 %v56_v12  ;;  %v62_v19 = vsel %vm49_vm0, %v40_v15, 0.0  ;;  %v65_v20 = vsel %vm49_vm0, %v41_v16, 0.0  ;;  %v68_v25 = vsel %vm49_vm0, %v42_v21, 0.0  ;;  %v71_v26 = vsel %vm49_vm0, %v43_v22, 0.0  ;;  %v27_v35 = vld [vmem:[%s410_s0 + $0x60] sm:$0xf] }
   0x7   :  { %v44_v27 = vmul.f32 %v201_v1, %v23_v23  ;;  %v45_v28 = vmul.f32 %v201_v1, %v24_v24  ;;  %v46_v33 = vmul.f32 %v201_v1, %v25_v29  ;;  %v47_v34 = vmul.f32 %v201_v1, %v26_v30 }
   0x8   :  { %v48_v38 = vmul.f32 %v201_v1, %v27_v35 }
   0x9   :  { %v74_v31 = vsel %vm49_vm0, %v44_v27, 0.0  ;;  %v77_v32 = vsel %vm49_vm0, %v45_v28, 0.0  ;;  %v80_v36 = vsel %vm49_vm0, %v46_v33, 0.0  ;;  %v83_v37 = vsel %vm49_vm0, %v47_v34, 0.0 }
   0xa   :  { %54 = vadd.xlane.f32.xlu0 %v53_v13  ;;  %60 = vadd.xlane.f32.xlu1 %v59_v14  ;;  %v87_v39 = vsel %vm86_vm1, %v48_v38, 0.0 }
   0xe   :  { %63 = vadd.xlane.f32.xlu0 %v62_v19  ;;  %66 = vadd.xlane.f32.xlu1 %v65_v20 }
  0x12   :  { %69 = vadd.xlane.f32.xlu0 %v68_v25  ;;  %72 = vadd.xlane.f32.xlu1 %v71_v26 }
  0x16   :  { %75 = vadd.xlane.f32.xlu0 %v74_v31  ;;  %78 = vadd.xlane.f32.xlu1 %v77_v32 }
  0x1a   :  { %81 = vadd.xlane.f32.xlu0 %v80_v36  ;;  %84 = vadd.xlane.f32.xlu1 %v83_v37 }
  0x1e   :  { %88 = vadd.xlane.f32.xlu0 %v87_v39 }
  0x93   :  { %v52_v41 = vpop.xlane.xlu0 %51  ;;  %v58_v42 = vpop.xlane.xlu1 %57 }
  0x94   :  { %v91_v43 = vadd.f32 %v344_v40, %v52_v41  ;;  %v93_v44 = vadd.f32 %v344_v40, %v58_v42 }
  0x96   :  { %v202_v45 = vmul.f32 -1.442695, %v91_v43  ;;  %v204_v46 = vmul.f32 -1.442695, %v93_v44 }
  0x97   :  { %v55_v47 = vpop.xlane.xlu0 %54  ;;  %v61_v48 = vpop.xlane.xlu1 %60 }
  0x98   :  { %215 = vpow2.f32 %v202_v45  ;;  %v92_v49 = vadd.f32 %v344_v40, %v55_v47  ;;  %v94_v50 = vadd.f32 %v344_v40, %v61_v48 }
  0x99   :  { %217 = vpow2.f32 %v204_v46 }
  0x9a   :  { %v203_v51 = vmul.f32 -1.442695, %v92_v49  ;;  %v205_v52 = vmul.f32 -1.442695, %v94_v50 }
  0x9b   :  { %v64_v53 = vpop.xlane.xlu0 %63  ;;  %v67_v54 = vpop.xlane.xlu1 %66 }
  0x9c   :  { %219 = vpow2.f32 %v203_v51  ;;  %v95_v55 = vadd.f32 %v344_v40, %v64_v53  ;;  %v96_v56 = vadd.f32 %v344_v40, %v67_v54 }
  0x9d   :  { %221 = vpow2.f32 %v205_v52 }
  0x9e   :  { %v206_v57 = vmul.f32 -1.442695, %v95_v55  ;;  %v207_v58 = vmul.f32 -1.442695, %v96_v56 }
  0x9f   :  { %v70_v59 = vpop.xlane.xlu0 %69  ;;  %v73_v60 = vpop.xlane.xlu1 %72 }
  0xa0   :  { %223 = vpow2.f32 %v206_v57  ;;  %v97_v61 = vadd.f32 %v344_v40, %v70_v59  ;;  %v98_v62 = vadd.f32 %v344_v40, %v73_v60 }
  0xa1   :  { %225 = vpow2.f32 %v207_v58 }
  0xa2   :  { %v216_v63 = vpop.eup %215  ;;  %v208_v0 = vmul.f32 -1.442695, %v97_v61  ;;  %v209_v3 = vmul.f32 -1.442695, %v98_v62 }
  0xa3   :  { %v218_v1 = vpop.eup %217  ;;  %v143_v2 = vadd.f32 1.0, %v216_v63  ;;  %v76_v4 = vpop.xlane.xlu0 %75 }
  0xa4   :  { %v79_v5 = vpop.xlane.xlu1 %78  ;;  %v145_v6 = vadd.f32 1.0, %v218_v1  ;;  %227 = vpow2.f32 %v208_v0  ;;  %v99_v7 = vadd.f32 %v344_v40, %v76_v4 }
  0xa5   :  { %v100_v8 = vadd.f32 %v344_v40, %v79_v5  ;;  %229 = vrcp.f32 %v143_v2 }
  0xa6   :  { %v220_v9 = vpop.eup %219  ;;  %231 = vrcp.f32 %v145_v6  ;;  %v210_v10 = vmul.f32 -1.442695, %v99_v7 }
  0xa7   :  { %v222_v11 = vpop.eup %221  ;;  %v144_v12 = vadd.f32 1.0, %v220_v9  ;;  %233 = vpow2.f32 %v209_v3  ;;  %v211_v13 = vmul.f32 -1.442695, %v100_v8  ;;  %v82_v14 = vpop.xlane.xlu0 %81 }
  0xa8   :  { %v85_v15 = vpop.xlane.xlu1 %84  ;;  %v146_v16 = vadd.f32 1.0, %v222_v11  ;;  %235 = vpow2.f32 %v210_v10  ;;  %v101_v17 = vadd.f32 %v344_v40, %v82_v14 }
  0xa9   :  { %v102_v18 = vadd.f32 %v344_v40, %v85_v15  ;;  %237 = vrcp.f32 %v144_v12 }
  0xaa   :  { %v224_v19 = vpop.eup %223  ;;  %239 = vrcp.f32 %v146_v16  ;;  %v212_v20 = vmul.f32 -1.442695, %v101_v17 }
  0xab   :  { %v226_v21 = vpop.eup %225  ;;  %v147_v22 = vadd.f32 1.0, %v224_v19  ;;  %241 = vpow2.f32 %v211_v13  ;;  %v213_v23 = vmul.f32 -1.442695, %v102_v18  ;;  %v89_v24 = vpop.xlane.xlu0 %88 }
  0xac   :  { %v148_v25 = vadd.f32 1.0, %v226_v21  ;;  %243 = vpow2.f32 %v212_v20  ;;  %v103_v26 = vadd.f32 %v344_v40, %v89_v24 }
  0xad   :  { %245 = vrcp.f32 %v147_v22 }
  0xae   :  { %v228_v27 = vpop.eup %227  ;;  %247 = vrcp.f32 %v148_v25  ;;  %v214_v28 = vmul.f32 -1.442695, %v103_v26 }
  0xaf   :  { %v230_v29 = vpop.eup %229  ;;  %v149_v30 = vadd.f32 1.0, %v228_v27  ;;  %249 = vpow2.f32 %v213_v23 }
  0xb0   :  { %v232_v31 = vpop.eup %231  ;;  %183 = vst.msk [vmem:[%s413_s3] sm:$0xff] %vm182_vm2, %v230_v29  ;;  %251 = vpow2.f32 %v214_v28 }
  0xb1   :  { %v234_v32 = vpop.eup %233  ;;  %185 = vst.msk [vmem:[%s413_s3 + $0x10] sm:$0xff] %vm182_vm2, %v232_v31  ;;  %253 = vrcp.f32 %v149_v30 }
  0xb2   :  { %v236_v33 = vpop.eup %235  ;;  %v150_v34 = vadd.f32 1.0, %v234_v32 }
  0xb3   :  { %v238_v35 = vpop.eup %237  ;;  %v151_v36 = vadd.f32 1.0, %v236_v33 }
  0xb4   :  { %v240_v37 = vpop.eup %239  ;;  %184 = vst.msk [vmem:[%s413_s3 + $0x8] sm:$0xff] %vm182_vm2, %v238_v35  ;;  %255 = vrcp.f32 %v150_v34 }
  0xb5   :  { %v242_v38 = vpop.eup %241  ;;  %186 = vst.msk [vmem:[%s413_s3 + $0x18] sm:$0xff] %vm182_vm2, %v240_v37  ;;  %257 = vrcp.f32 %v151_v36 }
  0xb6   :  { %v244_v39 = vpop.eup %243  ;;  %v152_v40 = vadd.f32 1.0, %v242_v38 }
  0xb7   :  { %v246_v41 = vpop.eup %245  ;;  %v153_v42 = vadd.f32 1.0, %v244_v39 }
  0xb8   :  { %v248_v43 = vpop.eup %247  ;;  %187 = vst.msk [vmem:[%s413_s3 + $0x20] sm:$0xff] %vm182_vm2, %v246_v41  ;;  %259 = vrcp.f32 %v152_v40 }
  0xb9   :  { %v250_v44 = vpop.eup %249  ;;  %188 = vst.msk [vmem:[%s413_s3 + $0x28] sm:$0xff] %vm182_vm2, %v248_v43  ;;  %261 = vrcp.f32 %v153_v42 }
  0xba   :  { %v252_v45 = vpop.eup %251  ;;  %v154_v46 = vadd.f32 1.0, %v250_v44 }
  0xbb   :  { %v254_v47 = vpop.eup %253  ;;  %v155_v48 = vadd.f32 1.0, %v252_v45 }
  0xbc   :  { %189 = vst.msk [vmem:[%s413_s3 + $0x30] sm:$0xff] %vm182_vm2, %v254_v47  ;;  %263 = vrcp.f32 %v154_v46 }
  0xbd   :  { %265 = vrcp.f32 %v155_v48 }
  0xbe   :  { %v256_v49 = vpop.eup %255 }
  0xbf   :  { %v258_v50 = vpop.eup %257  ;;  %190 = vst.msk [vmem:[%s413_s3 + $0x38] sm:$0xff] %vm182_vm2, %v256_v49 }
  0xc0   :  { %191 = vst.msk [vmem:[%s413_s3 + $0x40] sm:$0xff] %vm182_vm2, %v258_v50 }
  0xc2   :  { %v260_v51 = vpop.eup %259 }
  0xc3   :  { %v262_v52 = vpop.eup %261  ;;  %192 = vst.msk [vmem:[%s413_s3 + $0x48] sm:$0xff] %vm182_vm2, %v260_v51 }
  0xc4   :  { %193 = vst.msk [vmem:[%s413_s3 + $0x50] sm:$0xff] %vm182_vm2, %v262_v52 }
  0xc6   :  { %v264_v53 = vpop.eup %263 }
  0xc7   :  { %v266_v54 = vpop.eup %265  ;;  %194 = vst.msk [vmem:[%s413_s3 + $0x58] sm:$0xff] %vm182_vm2, %v264_v53 }
  0xc8   :  { %196 = vst.msk [vmem:[%s413_s3 + $0x60] sm:$0xf] %vm195_vm3, %v266_v54 }

</bundles_post_ra>
